<compile_context>
chip_gen: v7x
topology: tpu7x:2x2x1
jax: 0.10.0
libtpu: 0.0.40
codegen_flags: <defaults>
</compile_context>

<pallas_src>
import jax
import jax.numpy as jnp
from jax.experimental import pallas as pl
from jax.experimental.pallas import tpu as pltpu


# ---------------------------------------------------------------------------
# Circuit stand-ins (deterministic "eta" coefficients).
# ---------------------------------------------------------------------------
# eta = (e1, e2, e3, e4):  f(x) = e1 + e2 * tanh((x - e3) * e4)
_ACT_ETAS = (
    (0.05, 0.90, 0.40, 3.0),   # ACT1
    (0.10, 0.80, 0.50, 2.0),   # ACT2
    (0.00, 1.00, 0.30, 4.0),   # ACT3
    (0.15, 0.70, 0.60, 1.5),   # ACT4
)
_INV_ETA = (0.95, -0.90, 0.50, 2.5)   # INV (decreasing / inverter-like)
_ETA2_ACT1 = 0.5                      # ACT1.eta_fault[0, 2] used in theta init


def _circuit(x, eta):
    e1, e2, e3, e4 = eta
    return e1 + e2 * jnp.tanh((x - e3) * e4)


# ---------------------------------------------------------------------------
# Pallas kernel (one batch-tile per grid step).
# ---------------------------------------------------------------------------
def _player_kernel(a_ref, wp_ref, wn_ref, eta_ref, out_ref):
    a_ext = a_ref[...]                                   # (TB, E, M)  f32
    # a_neg = INV(a_extend); the last-column zeroing lives in Wn (row M-1
    # zeroed at prep time), so no iota/where masking in-kernel.
    a_neg = _circuit(a_ext, _INV_ETA)                    # (TB, E, M)  EUP/VPU

    # Two MXU contractions against the two weight stacks (no lane-axis
    # concatenate -> no relayout of the activation tile).
    z = jnp.einsum("bem,bmn->ben", a_ext, wp_ref[...],
                   preferred_element_type=jnp.float32)   # (TB, E, Nout)
    z = z + jnp.einsum("bem,bmn->ben", a_neg, wn_ref[...],
                       preferred_element_type=jnp.float32)

    # Single blended printed-tanh (hard one-hot alpha folded into eta).
    eta = eta_ref[...]                                   # (4, 1, Nout), resident
    a_new = eta[0] + eta[1] * jnp.tanh((z - eta[2]) * eta[3])
    out_ref[...] = a_new.astype(out_ref.dtype)


def _choose_tb(B, E, M, Nout, budget_bytes=4 << 20):
    # Largest divisor of B whose single-buffer tile footprint stays under
    # `budget_bytes` (double-buffering then stays well inside even v7x VMEM).
    per_b = 4 * (E * M + 2 * M * Nout + E * Nout)
    best = 1
    for d in range(1, B + 1):
        if B % d == 0 and d * per_b <= budget_bytes:
            best = d
    return best


def prepare_params(wp, wn, alpha):
    """One-time prep (NOT per forward call): zero Wn's last row, flatten the
    (F,V) batch, and fold the hard one-hot alpha into per-output-column
    effective activation coefficients."""
    F, V, M, Nout = wp.shape
    B = F * V
    # a_neg[..., -1] only ever multiplies Wn[M-1, :]; zero that Wn row instead
    # of masking the activation column inside the kernel.
    wn_z = wn.at[..., M - 1, :].set(0.0)
    wp_flat = wp.reshape(B, M, Nout).astype(jnp.float32)
    wn_flat = wn_z.reshape(B, M, Nout).astype(jnp.float32)

    etas = jnp.asarray(_ACT_ETAS, dtype=jnp.float32)          # (4 acts, 4 coeffs)
    eta_eff = jnp.einsum("kn,kc->cn", alpha, etas)            # (4 coeffs, Nout)
    eta_eff = eta_eff.reshape(4, 1, Nout).astype(jnp.float32)
    return wp_flat, wn_flat, eta_eff


def player_forward_pallas(a_ext, wp_flat, wn_flat, eta_eff, *, tb=None):
    F, V, E, M = a_ext.shape
    Nout = wp_flat.shape[-1]
    B = F * V
    a_flat = a_ext.reshape(B, E, M).astype(jnp.float32)

    if tb is None:
        tb = _choose_tb(B, E, M, Nout)
    grid = (B // tb,)

    # VMEM budget: double-buffered input/output tiles + resident eta + slack.
    tile_bytes = 4 * (tb * E * M + 2 * tb * M * Nout + tb * E * Nout)
    vmem_needed = 2 * tile_bytes + 4 * 4 * Nout + (1 << 20)
    vmem_limit = int(min(100 << 20, max(32 << 20, 2 * vmem_needed)))

    cost = pl.CostEstimate(
        flops=4 * B * E * M * Nout + 8 * B * E * (M + Nout),
        transcendentals=B * E * (M + Nout),
        bytes_accessed=4 * (B * E * M + 2 * B * M * Nout + B * E * Nout),
    )

    out = pl.pallas_call(
        _player_kernel,
        out_shape=jax.ShapeDtypeStruct((B, E, Nout), jnp.float32),
        grid_spec=pltpu.PrefetchScalarGridSpec(
            num_scalar_prefetch=0,
            grid=grid,
            in_specs=[
                pl.BlockSpec((tb, E, M), lambda b: (b, 0, 0)),
                pl.BlockSpec((tb, M, Nout), lambda b: (b, 0, 0)),
                pl.BlockSpec((tb, M, Nout), lambda b: (b, 0, 0)),
                # coefficients: same block every step -> stays resident
                pl.BlockSpec((4, 1, Nout), lambda b: (0, 0, 0)),
            ],
            out_specs=pl.BlockSpec((tb, E, Nout), lambda b: (b, 0, 0)),
        ),
        compiler_params=pltpu.CompilerParams(
            dimension_semantics=("parallel",),
            vmem_limit_bytes=vmem_limit,
        ),
        cost_estimate=cost,
    )(a_flat, wp_flat, wn_flat, eta_eff)
    return out.reshape(F, V, E, Nout)


# ---------------------------------------------------------------------------
# Parameter / input construction (glue, plain JAX).
# ---------------------------------------------------------------------------
def build_params(key, n_in, n_out, n_fault, n_var, *, gmin, gmax, epsilon):
    k_theta, k_coef, k_noise, k_gumbel = jax.random.split(key, 4)

    # ---- theta_ init (matches pLayer.__init__) ----
    theta = jax.random.uniform(k_theta, (n_in + 2, n_out)) / 100.0 + gmin
    theta = theta.at[-1, :].add(gmax)
    eta2 = _ETA2_ACT1
    theta = theta.at[-2, :].set(
        eta2 / (1.0 - eta2) * (jnp.sum(theta[:-2, :], axis=0) + theta[-1, :]))

    # ---- theta property: clamp + small-magnitude zeroing ----
    theta_c = jnp.clip(theta, -gmax, gmax)
    theta_c = jnp.where(jnp.abs(theta_c) < gmin, 0.0, theta_c)

    # ---- theta_noisy: broadcast over (F, V), apply device noise, fault mask = 1 ----
    mean = jnp.broadcast_to(theta_c, (n_fault, n_var, n_in + 2, n_out))
    noise = (jax.random.uniform(k_noise, mean.shape) * 2.0 - 1.0) * epsilon + 1.0
    theta_noisy = mean * noise   # FaultMask is all-ones

    # ---- W = |theta_noisy| / sum_M |theta_noisy| ----
    g = jnp.sum(jnp.abs(theta_noisy), axis=2, keepdims=True)
    w = jnp.abs(theta_noisy) / (g + 1e-10)

    positive = jnp.where(theta_noisy >= 0.0, 1.0, 0.0)
    negative = 1.0 - positive
    wp = (w * positive).astype(jnp.float32)
    wn = (w * negative).astype(jnp.float32)

    # ---- CoFF_ACT: gumbel-softmax hard (straight-through forward value) ----
    coef = jnp.clip(jax.random.uniform(k_coef, (4, n_out)), -1.0, 1.0)
    gumbel = -jnp.log(-jnp.log(jax.random.uniform(k_gumbel, coef.shape) + 1e-20) + 1e-20)
    logits = (coef + gumbel) / 1.0
    alpha_hard = jax.nn.one_hot(jnp.argmax(logits, axis=0), 4, axis=0,
                                dtype=jnp.float32)
    return wp, wn, alpha_hard


def extend_input(a):
    # a: [F, V, E, n_in] -> a_extend: [F, V, E, n_in + 2] (append ones, zeros)
    ones = jnp.ones(a.shape[:-1] + (1,), a.dtype)
    zeros = jnp.zeros_like(ones)
    return jnp.concatenate([a, ones, zeros], axis=-1)


def reference_forward(a_ext, wp, wn, alpha):
    # Original (unfused) semantics: INV, explicit last-column zeroing,
    # two matmuls, 4-way alpha blend.
    a_neg = _circuit(a_ext, _INV_ETA)
    a_neg = a_neg.at[..., -1].set(0.0)
    z = jnp.einsum("fvem,fvmn->fven", a_ext, wp) + \
        jnp.einsum("fvem,fvmn->fven", a_neg, wn)
    out = sum(alpha[k] * _circuit(z, _ACT_ETAS[k]) for k in range(4))
    return out


# ---------------------------------------------------------------------------
if __name__ == "__main__":
    n_in, n_out = 4, 8
    n_fault, n_var = 2, 2          # args.N_fault, args.N_train
    E = 8                          # batch / examples
    gmin, gmax, epsilon = 0.01, 10.0, 0.05

    key = jax.random.PRNGKey(0)
    k_param, k_x = jax.random.split(key)

    wp, wn, alpha = build_params(k_param, n_in, n_out, n_fault, n_var,
                                 gmin=gmin, gmax=gmax, epsilon=epsilon)

    # One-time parameter prep (moved out of the per-call wrapper).
    wp_flat, wn_flat, eta_eff = prepare_params(wp, wn, alpha)

    a_prev = jax.random.uniform(k_x, (n_fault, n_var, E, n_in),
                                dtype=jnp.float32)
    a_ext = extend_input(a_prev)

    out = player_forward_pallas(a_ext, wp_flat, wn_flat, eta_eff)
    out = jax.block_until_ready(out)

    ref = reference_forward(a_ext, wp, wn, alpha)
    assert out.shape == (n_fault, n_var, E, n_out)
    assert jnp.allclose(out, ref, atol=1e-5, rtol=1e-5), "mismatch vs reference"

    print("KERNEL_OK")
</pallas_src>

<mosaic_0001>
module attributes {stable_mosaic.version = 11 : i64} {
  func.func @_player_kernel(%arg0: i32, %arg1: memref<4x8x6xf32, #tpu.memory_space<vmem>>, %arg2: memref<4x6x8xf32, #tpu.memory_space<vmem>>, %arg3: memref<4x6x8xf32, #tpu.memory_space<vmem>>, %arg4: memref<4x1x8xf32, #tpu.memory_space<vmem>>, %arg5: memref<4x8x8xf32, #tpu.memory_space<vmem>>) attributes {dimension_semantics = [#tpu.dimension_semantics<parallel>], iteration_bounds = array<i64: 1>, scalar_prefetch = 0 : i64, scratch_operands = 0 : i64, tpu.core_type = #tpu.core_type<tc>, window_params = [{transform_indices = @transform_0, window_bounds = array<i64: 4, 8, 6>}, {transform_indices = @transform_1, window_bounds = array<i64: 4, 6, 8>}, {transform_indices = @transform_2, window_bounds = array<i64: 4, 6, 8>}, {pipeline_mode = #tpu.pipeline_mode<synchronous>, transform_indices = @transform_3, window_bounds = array<i64: 4, 1, 8>}, {transform_indices = @transform_4, window_bounds = array<i64: 4, 8, 8>}]} {
    %c0 = arith.constant 0 : index
    %c0_0 = arith.constant 0 : index
    %c0_1 = arith.constant 0 : index
    %0 = vector.load %arg1[%c0, %c0_0, %c0_1] : memref<4x8x6xf32, #tpu.memory_space<vmem>>, vector<4x8x6xf32>
    %cst = arith.constant 5.000000e-01 : f32
    %1 = vector.broadcast %cst : f32 to vector<4x8x6xf32>
    %2 = arith.subf %0, %1 : vector<4x8x6xf32>
    %cst_2 = arith.constant 2.500000e+00 : f32
    %3 = vector.broadcast %cst_2 : f32 to vector<4x8x6xf32>
    %4 = arith.mulf %2, %3 : vector<4x8x6xf32>
    %5 = math.tanh %4 : vector<4x8x6xf32>
    %cst_3 = arith.constant -0.899999976 : f32
    %6 = vector.broadcast %cst_3 : f32 to vector<4x8x6xf32>
    %7 = arith.mulf %6, %5 : vector<4x8x6xf32>
    %cst_4 = arith.constant 0.949999988 : f32
    %8 = vector.broadcast %cst_4 : f32 to vector<4x8x6xf32>
    %9 = arith.addf %8, %7 : vector<4x8x6xf32>
    %c0_5 = arith.constant 0 : index
    %c0_6 = arith.constant 0 : index
    %c0_7 = arith.constant 0 : index
    %10 = vector.load %arg2[%c0_5, %c0_6, %c0_7] : memref<4x6x8xf32, #tpu.memory_space<vmem>>, vector<4x6x8xf32>
    "tpu.trace_start"() <{level = 10 : i32, message = "bem,bmn->ben"}> : () -> ()
    %cst_8 = arith.constant dense<0.000000e+00> : vector<4x8x8xf32>
    %11 = tpu.matmul %0, %10, %cst_8 {dimension_numbers = #tpu.dot_dimension_numbers<[2], [1], [1], [2], [0, 0, 0, 1, 1, 2], [0], [0]>} : vector<4x8x6xf32>, vector<4x6x8xf32>, vector<4x8x8xf32> -> vector<4x8x8xf32>
    "tpu.trace_stop"() : () -> ()
    %c0_9 = arith.constant 0 : index
    %c0_10 = arith.constant 0 : index
    %c0_11 = arith.constant 0 : index
    %12 = vector.load %arg3[%c0_9, %c0_10, %c0_11] : memref<4x6x8xf32, #tpu.memory_space<vmem>>, vector<4x6x8xf32>
    "tpu.trace_start"() <{level = 10 : i32, message = "bem,bmn->ben"}> : () -> ()
    %cst_12 = arith.constant dense<0.000000e+00> : vector<4x8x8xf32>
    %13 = tpu.matmul %9, %12, %cst_12 {dimension_numbers = #tpu.dot_dimension_numbers<[2], [1], [1], [2], [0, 0, 0, 1, 1, 2], [0], [0]>} : vector<4x8x6xf32>, vector<4x6x8xf32>, vector<4x8x8xf32> -> vector<4x8x8xf32>
    "tpu.trace_stop"() : () -> ()
    %14 = arith.addf %11, %13 : vector<4x8x8xf32>
    %c0_13 = arith.constant 0 : index
    %c0_14 = arith.constant 0 : index
    %c0_15 = arith.constant 0 : index
    %15 = vector.load %arg4[%c0_13, %c0_14, %c0_15] : memref<4x1x8xf32, #tpu.memory_space<vmem>>, vector<4x1x8xf32>
    %16 = vector.extract_strided_slice %15 {offsets = [0, 0, 0], sizes = [1, 1, 8], strides = [1, 1, 1]} : vector<4x1x8xf32> to vector<1x1x8xf32>
    %17 = vector.shape_cast %16 : vector<1x1x8xf32> to vector<1x8xf32>
    %18 = vector.extract_strided_slice %15 {offsets = [1, 0, 0], sizes = [1, 1, 8], strides = [1, 1, 1]} : vector<4x1x8xf32> to vector<1x1x8xf32>
    %19 = vector.shape_cast %18 : vector<1x1x8xf32> to vector<1x8xf32>
    %20 = vector.extract_strided_slice %15 {offsets = [2, 0, 0], sizes = [1, 1, 8], strides = [1, 1, 1]} : vector<4x1x8xf32> to vector<1x1x8xf32>
    %21 = vector.shape_cast %20 : vector<1x1x8xf32> to vector<1x8xf32>
    %22 = vector.shape_cast %21 : vector<1x8xf32> to vector<1x1x8xf32>
    %23 = vector.broadcast %22 : vector<1x1x8xf32> to vector<4x8x8xf32>
    %24 = arith.subf %14, %23 : vector<4x8x8xf32>
    %25 = vector.extract_strided_slice %15 {offsets = [3, 0, 0], sizes = [1, 1, 8], strides = [1, 1, 1]} : vector<4x1x8xf32> to vector<1x1x8xf32>
    %26 = vector.shape_cast %25 : vector<1x1x8xf32> to vector<1x8xf32>
    %27 = vector.shape_cast %26 : vector<1x8xf32> to vector<1x1x8xf32>
    %28 = vector.broadcast %27 : vector<1x1x8xf32> to vector<4x8x8xf32>
    %29 = arith.mulf %24, %28 : vector<4x8x8xf32>
    %30 = math.tanh %29 : vector<4x8x8xf32>
    %31 = vector.shape_cast %19 : vector<1x8xf32> to vector<1x1x8xf32>
    %32 = vector.broadcast %31 : vector<1x1x8xf32> to vector<4x8x8xf32>
    %33 = arith.mulf %32, %30 : vector<4x8x8xf32>
    %34 = vector.shape_cast %17 : vector<1x8xf32> to vector<1x1x8xf32>
    %35 = vector.broadcast %34 : vector<1x1x8xf32> to vector<4x8x8xf32>
    %36 = arith.addf %35, %33 : vector<4x8x8xf32>
    %c0_16 = arith.constant 0 : index
    %c0_17 = arith.constant 0 : index
    %c0_18 = arith.constant 0 : index
    %37 = vector.load %arg5[%c0_16, %c0_17, %c0_18] : memref<4x8x8xf32, #tpu.memory_space<vmem>>, vector<4x8x8xf32>
    tpu.vector_store %arg5[%c0_16, %c0_17, %c0_18], %36 {strides = array<i32>} : memref<4x8x8xf32, #tpu.memory_space<vmem>>, vector<4x8x8xf32>,
    return
  }
  func.func @transform_0(%arg0: i32) -> (i32, i32, i32) {
    %c0_i32 = arith.constant 0 : i32
    %c0_i32_0 = arith.constant 0 : i32
    %c0_i32_1 = arith.constant 0 : i32
    return %arg0, %c0_i32, %c0_i32_0 : i32, i32, i32
  }
  func.func @transform_1(%arg0: i32) -> (i32, i32, i32) {
    %c0_i32 = arith.constant 0 : i32
    %c0_i32_0 = arith.constant 0 : i32
    %c0_i32_1 = arith.constant 0 : i32
    return %arg0, %c0_i32, %c0_i32_0 : i32, i32, i32
  }
  func.func @transform_2(%arg0: i32) -> (i32, i32, i32) {
    %c0_i32 = arith.constant 0 : i32
    %c0_i32_0 = arith.constant 0 : i32
    %c0_i32_1 = arith.constant 0 : i32
    return %arg0, %c0_i32, %c0_i32_0 : i32, i32, i32
  }
  func.func @transform_3(%arg0: i32) -> (i32, i32, i32) {
    %c0_i32 = arith.constant 0 : i32
    %c0_i32_0 = arith.constant 0 : i32
    %c0_i32_1 = arith.constant 0 : i32
    %c0_i32_2 = arith.constant 0 : i32
    return %c0_i32, %c0_i32_0, %c0_i32_1 : i32, i32, i32
  }
  func.func @transform_4(%arg0: i32) -> (i32, i32, i32) {
    %c0_i32 = arith.constant 0 : i32
    %c0_i32_0 = arith.constant 0 : i32
    %c0_i32_1 = arith.constant 0 : i32
    return %arg0, %c0_i32, %c0_i32_0 : i32, i32, i32
  }
}

</mosaic_0001>

<bundles_post_ra>
// kernel: tpu_custom_call.1
= control target key start
LH: loop header
LB: loop body
LE: loop exit
PB: predicated region body
PF: predicated region fallthrough
CT: control target
= control target key end

     0   :  { %vm54_vm0 = vcmask 1045504   ;;  %v862_v2 = vmov 0.0   ;;  %vm863_vm1 = vmmov 0   ;;  %s992_s0 = inlined_call_operand.vmem [shape: f32[4,8,6], index: 0, kind: input, shape index: {}]   ;;  %s993_s1 = inlined_call_operand.vmem [shape: f32[4,6,8], index: 1, kind: input, shape index: {}]   ;;  %s994_s2 = inlined_call_operand.vmem [shape: f32[4,6,8], index: 2, kind: input, shape index: {}]   ;;  %s995_s3 = inlined_call_operand.vmem [shape: f32[4,1,8], index: 3, kind: input, shape index: {}]   ;;  %s996_s4 = inlined_call_operand.hbm [shape: f32[4,8,8], index: 4, kind: output, shape index: {}]  }
   0x1   :  { %v46_v0 = vld [vmem:[%s994_s2] sm:$0x3f]  ;;  %v47_v1 = vld [vmem:[%s994_s2 + $0x8] sm:$0x3f]  ;;  %769 = vmatprep.subr.mxu0 %v862_v2  ;;  %774 = vmatprep.subr.mxu1 %v862_v2  ;;  %v20_v7 = vld [vmem:[%s992_s0 + $0x10] sm:$0xff] }
   0x2   :  { %v18_v3 = vld [vmem:[%s992_s0] sm:$0xff]  ;;  %v19_v4 = vld [vmem:[%s992_s0 + $0x8] sm:$0xff]  ;;  %770 = vmatpush3.msk.msra.mxu0 %vm54_vm0, %v46_v0  ;;  %775 = vmatpush3.msk.msra.mxu1 %vm54_vm0, %v47_v1  ;;  %v21_v8 = vld [vmem:[%s992_s0 + $0x18] sm:$0xff]  ;;  %v731_v9 = vadd.f32 -0.5, %v20_v7 }
   0x3   :  { %v729_v5 = vadd.f32 -0.5, %v18_v3  ;;  %v730_v6 = vadd.f32 -0.5, %v19_v4  ;;  %771 = vmatprep.mubr.msk.f32.mxu0 %vm863_vm1, %v862_v2  ;;  %776 = vmatprep.mubr.msk.f32.mxu1 %vm863_vm1, %v862_v2  ;;  %v732_v10 = vadd.f32 -0.5, %v21_v8 }
   0x4   :  { %779 = vmatprep.subr.mxu0 %v862_v2  ;;  %784 = vmatprep.subr.mxu1 %v862_v2  ;;  %v28_v13 = vmul.f32 2.5, %v731_v9 }
   0x5   :  { %v26_v11 = vmul.f32 2.5, %v729_v5  ;;  %v27_v12 = vmul.f32 2.5, %v730_v6  ;;  %v29_v14 = vmul.f32 2.5, %v732_v10 }
   0x6   :  { %9 = vsyncpa [#allocation3], 0  ;;  %vm50_vm2 = vcmask 48128   ;;  %v48_v22 = vld [vmem:[%s994_s2 + $0x10] sm:$0x3f]  ;;  %vm708_vm3 = vcmask 64512  }
   0x7   :  { %822 = vtanh.f32 %v26_v11  ;;  %v49_v25 = vld [vmem:[%s994_s2 + $0x18] sm:$0x3f]  ;;  %v42_v29 = vld [vmem:[%s993_s1] sm:$0x3f]  ;;  %v43_v30 = vld [vmem:[%s993_s1 + $0x8] sm:$0x3f] }
   0x8   :  { %824 = vtanh.f32 %v27_v12  ;;  %v44_v31 = vld [vmem:[%s993_s1 + $0x10] sm:$0x3f]  ;;  %v45_v32 = vld [vmem:[%s993_s1 + $0x18] sm:$0x3f]  ;;  %v749_v33 = vld [vmem:[%s995_s3 + $0x2] ss:$0 sm:$0xff] }
   0x9   :  { %826 = vtanh.f32 %v28_v13  ;;  %v750_v35 = vld [vmem:[%s995_s3 + $0x3] ss:$0 sm:$0xff]  ;;  %v751_v51 = vld [vmem:[%s995_s3 + $0x1] ss:$0 sm:$0xff]  ;;  %v752_v53 = vld [vmem:[%s995_s3] ss:$0 sm:$0xff] }
   0xa   :  { %828 = vtanh.f32 %v29_v14  ;;  %s864_s18 = smov [#allocation2]  }
   0xb   :  { %s718_s19 = sshll.u32 %s864_s18, 4  ;;  %s719_s19 = int_to_ptr.vmem [resolvable:$true] %s718_s19 }
   0xc   :  { %s838_s3 = scalar_lea.vmem %s719_s19, 512  ;;  %p843_p1 = scmp.lt.s32.totalorder %s719_s19, %s719_s19 }
   0xd   :  { %p839_p0 = scmp.ne.s32.totalorder %s719_s19, %s838_s3  ;;  %p844_p2 = scmp.lt.s32.totalorder %s838_s3, %s838_s3 }
   0xf   :  { %p845_p3 = por %p844_p2, %p843_p1 }
  0x11   :  { %v823_v15 = vpop.eup %822  ;;  %p846_p4 = pnand %p845_p3, %p839_p0 }
  0x12   :  { %v825_v16 = vpop.eup %824  ;;  %v34_v17 = vmul.f32 -0.9, %v823_v15 }
  0x13   :  { %v827_v18 = vpop.eup %826  ;;  %v35_v19 = vmul.f32 -0.9, %v825_v16 }
  0x14   :  { %v829_v20 = vpop.eup %828  ;;  %v38_v21 = vadd.f32 0.95, %v34_v17  ;;  %v36_v23 = vmul.f32 -0.9, %v827_v18 }
  0x15   :  { %v39_v24 = vadd.f32 0.95, %v35_v19  ;;  %v37_v26 = vmul.f32 -0.9, %v829_v20 }
  0x16   :  { %772 = vmatmul.mubr.msk.f32.vlgmr.msra.gmra.mrb[0].mxu0 %vm50_vm2, %v38_v21  ;;  %v40_v27 = vadd.f32 0.95, %v36_v23 }
  0x17   :  { %777 = vmatmul.mubr.msk.f32.vlgmr.msra.gmra.mrb[0].mxu1 %vm50_vm2, %v39_v24  ;;  %780 = vmatpush3.msk.msra.mxu0 %vm54_vm0, %v48_v22  ;;  %v41_v28 = vadd.f32 0.95, %v37_v26 }
  0x18   :  { %785 = vmatpush3.msk.msra.mxu1 %vm54_vm0, %v49_v25  ;;  %781 = vmatprep.mubr.msk.f32.mxu0 %vm863_vm1, %v862_v2 }
  0x19   :  { %786 = vmatprep.mubr.msk.f32.mxu1 %vm863_vm1, %v862_v2  ;;  %789 = vmatprep.subr.mxu0 %v862_v2 }
  0x1a   :  { %794 = vmatprep.subr.mxu1 %v862_v2  ;;  %782 = vmatmul.mubr.msk.f32.vlgmr.msra.gmra.mrb[2].mxu0 %vm50_vm2, %v40_v27 }
  0x1b   :  { %787 = vmatmul.mubr.msk.f32.vlgmr.msra.gmra.mrb[2].mxu1 %vm50_vm2, %v41_v28  ;;  %790 = vmatpush3.msk.msra.mxu0 %vm54_vm0, %v42_v29 }
  0x1c   :  { %795 = vmatpush3.msk.msra.mxu1 %vm54_vm0, %v43_v30  ;;  %791 = vmatprep.mubr.msk.f32.mxu0 %vm863_vm1, %v862_v2 }
  0x1d   :  { %796 = vmatprep.mubr.msk.f32.mxu1 %vm863_vm1, %v862_v2  ;;  %799 = vmatprep.subr.mxu0 %v862_v2 }
  0x1e   :  { %804 = vmatprep.subr.mxu1 %v862_v2  ;;  %792 = vmatmul.mubr.msk.f32.vlgmr.msra.gmra.mrb[0].mxu0 %vm50_vm2, %v18_v3 }
  0x1f   :  { %797 = vmatmul.mubr.msk.f32.vlgmr.msra.gmra.mrb[0].mxu1 %vm50_vm2, %v19_v4  ;;  %800 = vmatpush3.msk.msra.mxu0 %vm54_vm0, %v44_v31 }
  0x20   :  { %805 = vmatpush3.msk.msra.mxu1 %vm54_vm0, %v45_v32  ;;  %801 = vmatprep.mubr.msk.f32.mxu0 %vm863_vm1, %v862_v2 }
  0x21   :  { %806 = vmatprep.mubr.msk.f32.mxu1 %vm863_vm1, %v862_v2 }
  0x22   :  { %802 = vmatmul.mubr.msk.f32.vlgmr.msra.gmra.mrb[2].mxu0 %vm50_vm2, %v20_v7 }
  0x23   :  { %807 = vmatmul.mubr.msk.f32.vlgmr.msra.gmra.mrb[2].mxu1 %vm50_vm2, %v21_v8 }
  0xf1   :  { %v428_v34 = vpop.f32.mrb[0].mxu0 }
  0xf2   :  { %v670_v36 = vsub.f32 %v428_v34, %v749_v33  ;;  %v504_v37 = vpop.f32.mrb[0].mxu1  ;;  %v793_v38 = vpop.f32.mrb[1].mxu0 }
  0xf3   :  { %v671_v39 = vsub.f32 %v504_v37, %v749_v33  ;;  %v798_v40 = vpop.f32.mrb[1].mxu1 }
  0xf4   :  { %v680_v41 = vmul.f32 %v750_v35, %v670_v36 }
  0xf5   :  { %v681_v42 = vmul.f32 %v750_v35, %v671_v39  ;;  %v580_v43 = vpop.f32.mrb[2].mxu0 }
  0xf6   :  { %830 = vtanh.f32 %v680_v41  ;;  %v672_v44 = vsub.f32 %v580_v43, %v749_v33  ;;  %v656_v45 = vpop.f32.mrb[2].mxu1  ;;  %v803_v46 = vpop.f32.mrb[3].mxu0 }
  0xf7   :  { %832 = vtanh.f32 %v681_v42  ;;  %v673_v47 = vsub.f32 %v656_v45, %v749_v33  ;;  %v808_v48 = vpop.f32.mrb[3].mxu1 }
  0xf8   :  { %v682_v49 = vmul.f32 %v750_v35, %v672_v44 }
  0xf9   :  { %v683_v50 = vmul.f32 %v750_v35, %v673_v47 }
  0xfa   :  { %834 = vtanh.f32 %v682_v49 }
  0xfb   :  { %836 = vtanh.f32 %v683_v50 }
 0x100   :  { %v831_v52 = vpop.eup %830 }
 0x101   :  { %v833_v54 = vpop.eup %832  ;;  %v694_v55 = vmul.f32 %v831_v52, %v751_v51 }
 0x102   :  { %v695_v56 = vmul.f32 %v833_v54, %v751_v51 }
 0x103   :  { %v704_v57 = vadd.f32 %v752_v53, %v694_v55 }
 0x104   :  { %v835_v58 = vpop.eup %834  ;;  %v705_v59 = vadd.f32 %v752_v53, %v695_v56 }
 0x105   :  { %v837_v60 = vpop.eup %836  ;;  %v696_v61 = vmul.f32 %v835_v58, %v751_v51  ;;  %709 = vst.msk [vmem:[#allocation2] sm:$0xff] %vm708_vm3, %v704_v57 }
 0x106   :  { %v697_v62 = vmul.f32 %v837_v60, %v751_v51  ;;  %710 = vst.msk [vmem:[#allocation2 + $0x8] sm:$0xff] %vm708_vm3, %v705_v59 }
 0x107   :  { %v706_v63 = vadd.f32 %v752_v53, %v696_v61 }
 0x108   :  { %v707_v0 = vadd.f32 %v752_v53, %v697_v62 }
 0x109   :  { %711 = vst.msk [vmem:[#allocation2 + $0x10] sm:$0xff] %vm708_vm3, %v706_v63 }
 0x10a   :  { %712 = vst.msk [vmem:[#allocation2 + $0x18] sm:$0xff] %vm708_vm3, %v707_v0 }
 0x10b   :  { %849 = shalt.err (!%p846_p4)
}
 0x10c   :  { %s850_s22 = scalar_lea.hbm %s996_s4, 512 }
 0x10d   :  { %p851_p5 = scmp.ne.s32.totalorder %s996_s4, %s850_s22  ;;  %p854_p6 = scmp.lt.u32.totalorder %s850_s22, %s996_s4 }
 0x10f   :  { %p856_p7 = pnand %p854_p6, %p851_p5 }
 0x111   :  { %859 = shalt.err (!%p856_p7)
}
 0x112   :  { %s865_s0 = smov 128   ;;  %s866_s27 = smov 8  }
 0x113   :  { %724 = dma.vmem_to_hbm [thread:$0]  %s719_s19, 512, %s996_s4, [#allocation3], %s865_s0, %s865_s0, %s866_s27  }
 0x114   :  { %860 = dma.done.wait [#allocation3], 512  }
 0x115   :  { %861 = vsyncadd [#allocation3], 4294966784 }
 0x116   :  { %728 = vsyncpa [#allocation3], 1 }

</bundles_post_ra>
